<compile_context>
chip_gen: v7x
topology: tpu7x:2x2x1
jax: 0.10.0
libtpu: 0.0.40
codegen_flags: <defaults>
</compile_context>

<pallas_src>
import functools

import jax
import jax.numpy as jnp
from jax.experimental import pallas as pl
from jax.experimental.pallas import tpu as pltpu

SMOOTH = 1e-5
_LANES = 128
_DEFAULT_MAX_TILE_ROWS = 1024  # sublanes per spatial tile (x 128 lanes)


def _dice_sums_kernel(p_ref, t_ref, o_ref, *, hw, s_tile, ragged, use_sigmoid):
    """Per-(batch, spatial-tile) partial sums for the dice loss.

    p_ref: (1, C, s_tile, 128)   logits tile (original dtype)
    t_ref: (1, 1, s_tile, 128)   target tile (original / uint8 dtype)
    o_ref: (1, 5, s_acc, 128)    f32 lane-parallel partials, resident across the
                                 spatial grid axis:
                                 [sum p0, sum p1, sum p0*t, sum p1*t, sum t]
    """
    C = p_ref.shape[1]
    s = pl.program_id(1)

    @pl.when(s == 0)
    def _():
        o_ref[...] = jnp.zeros_like(o_ref)

    t = t_ref[0, 0].astype(jnp.float32)                      # (s_tile, 128)

    if use_sigmoid:
        # C == 2: softmax channel-1 prob is exactly sigmoid(x1 - x0).
        x0 = p_ref[0, 0].astype(jnp.float32)
        x1 = p_ref[0, 1].astype(jnp.float32)
        p1 = 1.0 / (1.0 + jnp.exp(x0 - x1))
        p0 = 1.0 - p1
    else:
        # Channel softmax, unrolled over C: per-channel (s_tile, 128) slabs,
        # elementwise max / exp / add only (no cross-lane work); only channels
        # 0 and 1 are ever normalized.
        m = p_ref[0, 0].astype(jnp.float32)
        for c in range(1, C):
            m = jnp.maximum(m, p_ref[0, c].astype(jnp.float32))
        e0 = jnp.exp(p_ref[0, 0].astype(jnp.float32) - m)
        e1 = jnp.exp(p_ref[0, 1].astype(jnp.float32) - m)
        denom = e0 + e1
        for c in range(2, C):
            denom = denom + jnp.exp(p_ref[0, c].astype(jnp.float32) - m)
        r = 1.0 / denom        # exact divide keeps 1e-5 parity with reference
        p0 = e0 * r
        p1 = e1 * r

    if ragged:
        # Mask spatial positions >= H*W (lane-pad zeros and/or garbage rows of
        # the ragged last tile).  Pure VPU selects; this branch is statically
        # removed when the grid tiles H*W exactly.
        row = jax.lax.broadcasted_iota(jnp.int32, (s_tile, _LANES), 0)
        col = jax.lax.broadcasted_iota(jnp.int32, (s_tile, _LANES), 1)
        idx = s * (s_tile * _LANES) + row * _LANES + col
        keep = idx < hw
        zero = jnp.float32(0.0)
        p0 = jnp.where(keep, p0, zero)
        p1 = jnp.where(keep, p1, zero)
        t = jnp.where(keep, t, zero)

    if s_tile % 8 == 0:
        def fold(x):
            # (s_tile, 128) -> (8, 128): tile-aligned reshape + vreg adds (VPU).
            return jnp.sum(x.reshape(s_tile // 8, 8, _LANES), axis=0)
    else:
        def fold(x):
            # Tiny single-tile fallback: one cross-sublane reduce.
            return jnp.sum(x, axis=0, keepdims=True)

    o_ref[0, 0] += fold(p0)
    o_ref[0, 1] += fold(p1)
    o_ref[0, 2] += fold(p0 * t)
    o_ref[0, 3] += fold(p1 * t)
    o_ref[0, 4] += fold(t)


def dice_loss(predicts, target, *, max_tile_rows=_DEFAULT_MAX_TILE_ROWS):
    """predicts: (B, C, H, W) logits; target: (B, H, W) binary mask."""
    B, C, H, W = predicts.shape
    assert C >= 2, "Dice_Loss uses softmax channels 0 and 1; need C >= 2"
    HW = H * W

    # Bool targets: ship as uint8 (4x less HBM traffic than f32); numeric
    # dtypes pass through as-is and are upcast to f32 inside the kernel.
    if target.dtype == jnp.bool_:
        target = target.astype(jnp.uint8)

    # Lane-dense spatial layout (B, C, s_rows, 128).  The reshape is free when
    # H*W is a multiple of 128; otherwise a small (<128 elems) zero lane-pad is
    # added — padded positions are masked exactly inside the kernel, so there is
    # never a full-array padding concatenate.
    hw128 = -(-HW // _LANES) * _LANES
    s_rows = hw128 // _LANES

    p = predicts.reshape(B, C, HW)
    t = target.reshape(B, 1, HW)
    if hw128 != HW:
        p = jnp.pad(p, ((0, 0), (0, 0), (0, hw128 - HW)))
        t = jnp.pad(t, ((0, 0), (0, 0), (0, hw128 - HW)))
    p = p.reshape(B, C, s_rows, _LANES)
    t = t.reshape(B, 1, s_rows, _LANES)

    # Spatial tile size: biggest that stays comfortably under the scoped-VMEM
    # defaults on all generations (scaled down for large C); multiple of 32 so
    # uint8 targets keep their native (32,128) tiling.
    cap = max_tile_rows
    if C > 4:
        cap = max(128, (max_tile_rows * 4 // C) // 32 * 32)
    s_tile = s_rows if s_rows <= cap else cap
    n_s = -(-s_rows // s_tile)
    s_acc = 8 if s_tile % 8 == 0 else 1
    ragged = (n_s * s_tile * _LANES) != HW

    kernel = functools.partial(
        _dice_sums_kernel,
        hw=HW, s_tile=s_tile, ragged=ragged, use_sigmoid=(C == 2))

    partials = pl.pallas_call(
        kernel,
        out_shape=jax.ShapeDtypeStruct((B, 5, s_acc, _LANES), jnp.float32),
        grid_spec=pltpu.PrefetchScalarGridSpec(
            num_scalar_prefetch=0,
            grid=(B, n_s),
            in_specs=[
                pl.BlockSpec((1, C, s_tile, _LANES), lambda b, s: (b, 0, s, 0)),
                pl.BlockSpec((1, 1, s_tile, _LANES), lambda b, s: (b, 0, s, 0)),
            ],
            out_specs=pl.BlockSpec((1, 5, s_acc, _LANES),
                                   lambda b, s: (b, 0, 0, 0)),
        ),
        compiler_params=pltpu.CompilerParams(
            dimension_semantics=("parallel", "arbitrary")),
        cost_estimate=pl.CostEstimate(
            flops=int(B * n_s * s_tile * _LANES * (4 * C + 14)),
            transcendentals=int(B * HW * (1 if C == 2 else C)),
            bytes_accessed=int(B * n_s * s_tile * _LANES
                               * (C * p.dtype.itemsize + t.dtype.itemsize)
                               + B * 5 * s_acc * _LANES * 4),
        ),
    )(p, t)

    # Finalize per-batch dice in plain JAX (tiny reductions + scalar math).
    sums = jnp.sum(partials, axis=(2, 3))                    # (B, 5)
    sum_p0, sum_p1 = sums[:, 0], sums[:, 1]
    sum_p0t, sum_p1t, sum_t = sums[:, 2], sums[:, 3], sums[:, 4]

    hw = jnp.float32(HW)
    inter0 = sum_p0 - sum_p0t                  # == sum(p0 * (1 - t))
    union0 = sum_p0 + (hw - sum_t) + SMOOTH    # sum(p0) + sum(1 - t) + smooth
    inter1 = sum_p1t
    union1 = sum_p1 + sum_t + SMOOTH
    loss0 = 1.0 - 2.0 * inter0 / union0
    loss1 = 1.0 - 2.0 * inter1 / union1
    return (jnp.mean(loss0) + jnp.mean(loss1)) / 2.0


def _dice_loss_ref(predicts, target):
    # pure-JAX reference mirroring the PyTorch module
    preds = jax.nn.softmax(predicts, axis=1)
    tgt = target.astype(jnp.float32)
    B = predicts.shape[0]

    def dl(pred, tg):
        yp = pred.reshape(B, -1)
        yt = tg.reshape(B, -1)
        inter = jnp.sum(yp * yt, axis=1)
        union = jnp.sum(yp, axis=1) + jnp.sum(yt, axis=1) + SMOOTH
        return 1.0 - 2.0 * inter / union

    d0 = dl(preds[:, 0, :, :], 1.0 - tgt)
    d1 = dl(preds[:, 1, :, :], tgt)
    return (jnp.mean(d0) + jnp.mean(d1)) / 2.0


if __name__ == "__main__":
    key = jax.random.PRNGKey(0)

    cases = [
        # (B, C, H, W, bool_target, max_tile_rows)
        (2, 4, 16, 16, False, _DEFAULT_MAX_TILE_ROWS),  # exact tiling, C>2 softmax
        (2, 2, 15, 15, True, _DEFAULT_MAX_TILE_ROWS),   # sigmoid path + lane-pad mask + uint8 target
        (1, 3, 40, 40, False, 8),                       # multi-tile spatial grid + ragged last tile
    ]
    for i, (B, C, H, W, bool_t, mtr) in enumerate(cases):
        kp, kt = jax.random.split(jax.random.fold_in(key, i))
        predicts = jax.random.normal(kp, (B, C, H, W), dtype=jnp.float32)
        tgt_bool = jax.random.bernoulli(kt, 0.5, (B, H, W))
        target = tgt_bool if bool_t else tgt_bool.astype(jnp.float32)

        out = jax.block_until_ready(dice_loss(predicts, target, max_tile_rows=mtr))
        ref = jax.block_until_ready(_dice_loss_ref(predicts, target))
        assert jnp.allclose(out, ref, atol=1e-5, rtol=1e-5), (i, out, ref)

    print("KERNEL_OK")
</pallas_src>

<mosaic_0001>
module attributes {stable_mosaic.version = 11 : i64} {
  func.func @_dice_sums_kernel(%arg0: i32, %arg1: i32, %arg2: memref<1x4x2x128xf32, #tpu.memory_space<vmem>>, %arg3: memref<1x1x2x128xf32, #tpu.memory_space<vmem>>, %arg4: memref<1x5x1x128xf32, #tpu.memory_space<vmem>>) attributes {dimension_semantics = [#tpu.dimension_semantics<parallel>, #tpu.dimension_semantics<arbitrary>], iteration_bounds = array<i64: 2, 1>, scalar_prefetch = 0 : i64, scratch_operands = 0 : i64, tpu.core_type = #tpu.core_type<tc>, window_params = [{transform_indices = @transform_0, window_bounds = array<i64: 1, 4, 2, 128>}, {transform_indices = @transform_1, window_bounds = array<i64: 1, 1, 2, 128>}, {transform_indices = @transform_2, window_bounds = array<i64: 1, 5, 1, 128>}]} {
    %c0_i32 = arith.constant 0 : i32
    %0 = arith.cmpi eq, %arg1, %c0_i32 : i32
    %1 = arith.extui %0 : i1 to i32
    %c0_i32_0 = arith.constant 0 : i32
    %2 = arith.cmpi ne, %1, %c0_i32_0 : i32
    scf.if %2 {
      %cst_77 = arith.constant 0.000000e+00 : f32
      %81 = vector.broadcast %cst_77 : f32 to vector<1x5x1x128xf32>
      %c0_78 = arith.constant 0 : index
      %c0_79 = arith.constant 0 : index
      %c0_80 = arith.constant 0 : index
      %c0_81 = arith.constant 0 : index
      %82 = vector.load %arg4[%c0_78, %c0_79, %c0_80, %c0_81] : memref<1x5x1x128xf32, #tpu.memory_space<vmem>>, vector<1x5x1x128xf32>
      tpu.vector_store %arg4[%c0_78, %c0_79, %c0_80, %c0_81], %81 {strides = array<i32>} : memref<1x5x1x128xf32, #tpu.memory_space<vmem>>, vector<1x5x1x128xf32>,
    } else {
    }
    %c0 = arith.constant 0 : index
    %c0_1 = arith.constant 0 : index
    %c0_2 = arith.constant 0 : index
    %c0_3 = arith.constant 0 : index
    %3 = vector.load %arg3[%c0, %c0_1, %c0_2, %c0_3] : memref<1x1x2x128xf32, #tpu.memory_space<vmem>>, vector<1x1x2x128xf32>
    %4 = vector.shape_cast %3 : vector<1x1x2x128xf32> to vector<2x128xf32>
    %c0_4 = arith.constant 0 : index
    %c0_5 = arith.constant 0 : index
    %c0_6 = arith.constant 0 : index
    %c0_7 = arith.constant 0 : index
    %5 = vector.load %arg2[%c0_4, %c0_5, %c0_6, %c0_7] : memref<1x4x2x128xf32, #tpu.memory_space<vmem>>, vector<1x1x2x128xf32>
    %6 = vector.shape_cast %5 : vector<1x1x2x128xf32> to vector<2x128xf32>
    %c0_8 = arith.constant 0 : index
    %c1 = arith.constant 1 : index
    %c0_9 = arith.constant 0 : index
    %c0_10 = arith.constant 0 : index
    %7 = vector.load %arg2[%c0_8, %c1, %c0_9, %c0_10] : memref<1x4x2x128xf32, #tpu.memory_space<vmem>>, vector<1x1x2x128xf32>
    %8 = vector.shape_cast %7 : vector<1x1x2x128xf32> to vector<2x128xf32>
    %9 = arith.maximumf %6, %8 : vector<2x128xf32>
    %c0_11 = arith.constant 0 : index
    %c2 = arith.constant 2 : index
    %c0_12 = arith.constant 0 : index
    %c0_13 = arith.constant 0 : index
    %10 = vector.load %arg2[%c0_11, %c2, %c0_12, %c0_13] : memref<1x4x2x128xf32, #tpu.memory_space<vmem>>, vector<1x1x2x128xf32>
    %11 = vector.shape_cast %10 : vector<1x1x2x128xf32> to vector<2x128xf32>
    %12 = arith.maximumf %9, %11 : vector<2x128xf32>
    %c0_14 = arith.constant 0 : index
    %c3 = arith.constant 3 : index
    %c0_15 = arith.constant 0 : index
    %c0_16 = arith.constant 0 : index
    %13 = vector.load %arg2[%c0_14, %c3, %c0_15, %c0_16] : memref<1x4x2x128xf32, #tpu.memory_space<vmem>>, vector<1x1x2x128xf32>
    %14 = vector.shape_cast %13 : vector<1x1x2x128xf32> to vector<2x128xf32>
    %15 = arith.maximumf %12, %14 : vector<2x128xf32>
    %c0_17 = arith.constant 0 : index
    %c0_18 = arith.constant 0 : index
    %c0_19 = arith.constant 0 : index
    %c0_20 = arith.constant 0 : index
    %16 = vector.load %arg2[%c0_17, %c0_18, %c0_19, %c0_20] : memref<1x4x2x128xf32, #tpu.memory_space<vmem>>, vector<1x1x2x128xf32>
    %17 = vector.shape_cast %16 : vector<1x1x2x128xf32> to vector<2x128xf32>
    %18 = arith.subf %17, %15 : vector<2x128xf32>
    %19 = math.exp %18 : vector<2x128xf32>
    %c0_21 = arith.constant 0 : index
    %c1_22 = arith.constant 1 : index
    %c0_23 = arith.constant 0 : index
    %c0_24 = arith.constant 0 : index
    %20 = vector.load %arg2[%c0_21, %c1_22, %c0_23, %c0_24] : memref<1x4x2x128xf32, #tpu.memory_space<vmem>>, vector<1x1x2x128xf32>
    %21 = vector.shape_cast %20 : vector<1x1x2x128xf32> to vector<2x128xf32>
    %22 = arith.subf %21, %15 : vector<2x128xf32>
    %23 = math.exp %22 : vector<2x128xf32>
    %24 = arith.addf %19, %23 : vector<2x128xf32>
    %c0_25 = arith.constant 0 : index
    %c2_26 = arith.constant 2 : index
    %c0_27 = arith.constant 0 : index
    %c0_28 = arith.constant 0 : index
    %25 = vector.load %arg2[%c0_25, %c2_26, %c0_27, %c0_28] : memref<1x4x2x128xf32, #tpu.memory_space<vmem>>, vector<1x1x2x128xf32>
    %26 = vector.shape_cast %25 : vector<1x1x2x128xf32> to vector<2x128xf32>
    %27 = arith.subf %26, %15 : vector<2x128xf32>
    %28 = math.exp %27 : vector<2x128xf32>
    %29 = arith.addf %24, %28 : vector<2x128xf32>
    %c0_29 = arith.constant 0 : index
    %c3_30 = arith.constant 3 : index
    %c0_31 = arith.constant 0 : index
    %c0_32 = arith.constant 0 : index
    %30 = vector.load %arg2[%c0_29, %c3_30, %c0_31, %c0_32] : memref<1x4x2x128xf32, #tpu.memory_space<vmem>>, vector<1x1x2x128xf32>
    %31 = vector.shape_cast %30 : vector<1x1x2x128xf32> to vector<2x128xf32>
    %32 = arith.subf %31, %15 : vector<2x128xf32>
    %33 = math.exp %32 : vector<2x128xf32>
    %34 = arith.addf %29, %33 : vector<2x128xf32>
    %cst = arith.constant 1.000000e+00 : f32
    %35 = vector.broadcast %cst : f32 to vector<2x128xf32>
    %36 = arith.divf %35, %34 : vector<2x128xf32>
    %37 = arith.mulf %19, %36 : vector<2x128xf32>
    %38 = arith.mulf %23, %36 : vector<2x128xf32>
    %c0_33 = arith.constant 0 : index
    %c0_34 = arith.constant 0 : index
    %c0_35 = arith.constant 0 : index
    %c0_36 = arith.constant 0 : index
    %39 = vector.load %arg4[%c0_33, %c0_34, %c0_35, %c0_36] : memref<1x5x1x128xf32, #tpu.memory_space<vmem>>, vector<1x1x1x128xf32>
    %40 = vector.shape_cast %39 : vector<1x1x1x128xf32> to vector<1x128xf32>
    %cst_37 = arith.constant dense<0.000000e+00> : vector<128xf32>
    %41 = vector.multi_reduction <add>, %37, %cst_37 [0] : vector<2x128xf32> to vector<128xf32>
    %42 = vector.shape_cast %41 : vector<128xf32> to vector<1x128xf32>
    %43 = arith.addf %40, %42 : vector<1x128xf32>
    %c0_38 = arith.constant 0 : index
    %c0_39 = arith.constant 0 : index
    %c0_40 = arith.constant 0 : index
    %c0_41 = arith.constant 0 : index
    %44 = vector.load %arg4[%c0_38, %c0_39, %c0_40, %c0_41] : memref<1x5x1x128xf32, #tpu.memory_space<vmem>>, vector<1x1x1x128xf32>
    %45 = vector.shape_cast %44 : vector<1x1x1x128xf32> to vector<1x128xf32>
    %46 = vector.shape_cast %43 : vector<1x128xf32> to vector<1x1x1x128xf32>
    tpu.vector_store %arg4[%c0_38, %c0_39, %c0_40, %c0_41], %46 {strides = array<i32>} : memref<1x5x1x128xf32, #tpu.memory_space<vmem>>, vector<1x1x1x128xf32>,
    %c0_42 = arith.constant 0 : index
    %c1_43 = arith.constant 1 : index
    %c0_44 = arith.constant 0 : index
    %c0_45 = arith.constant 0 : index
    %47 = vector.load %arg4[%c0_42, %c1_43, %c0_44, %c0_45] : memref<1x5x1x128xf32, #tpu.memory_space<vmem>>, vector<1x1x1x128xf32>
    %48 = vector.shape_cast %47 : vector<1x1x1x128xf32> to vector<1x128xf32>
    %cst_46 = arith.constant dense<0.000000e+00> : vector<128xf32>
    %49 = vector.multi_reduction <add>, %38, %cst_46 [0] : vector<2x128xf32> to vector<128xf32>
    %50 = vector.shape_cast %49 : vector<128xf32> to vector<1x128xf32>
    %51 = arith.addf %48, %50 : vector<1x128xf32>
    %c0_47 = arith.constant 0 : index
    %c1_48 = arith.constant 1 : index
    %c0_49 = arith.constant 0 : index
    %c0_50 = arith.constant 0 : index
    %52 = vector.load %arg4[%c0_47, %c1_48, %c0_49, %c0_50] : memref<1x5x1x128xf32, #tpu.memory_space<vmem>>, vector<1x1x1x128xf32>
    %53 = vector.shape_cast %52 : vector<1x1x1x128xf32> to vector<1x128xf32>
    %54 = vector.shape_cast %51 : vector<1x128xf32> to vector<1x1x1x128xf32>
    tpu.vector_store %arg4[%c0_47, %c1_48, %c0_49, %c0_50], %54 {strides = array<i32>} : memref<1x5x1x128xf32, #tpu.memory_space<vmem>>, vector<1x1x1x128xf32>,
    %c0_51 = arith.constant 0 : index
    %c2_52 = arith.constant 2 : index
    %c0_53 = arith.constant 0 : index
    %c0_54 = arith.constant 0 : index
    %55 = vector.load %arg4[%c0_51, %c2_52, %c0_53, %c0_54] : memref<1x5x1x128xf32, #tpu.memory_space<vmem>>, vector<1x1x1x128xf32>
    %56 = vector.shape_cast %55 : vector<1x1x1x128xf32> to vector<1x128xf32>
    %57 = arith.mulf %37, %4 : vector<2x128xf32>
    %cst_55 = arith.constant dense<0.000000e+00> : vector<128xf32>
    %58 = vector.multi_reduction <add>, %57, %cst_55 [0] : vector<2x128xf32> to vector<128xf32>
    %59 = vector.shape_cast %58 : vector<128xf32> to vector<1x128xf32>
    %60 = arith.addf %56, %59 : vector<1x128xf32>
    %c0_56 = arith.constant 0 : index
    %c2_57 = arith.constant 2 : index
    %c0_58 = arith.constant 0 : index
    %c0_59 = arith.constant 0 : index
    %61 = vector.load %arg4[%c0_56, %c2_57, %c0_58, %c0_59] : memref<1x5x1x128xf32, #tpu.memory_space<vmem>>, vector<1x1x1x128xf32>
    %62 = vector.shape_cast %61 : vector<1x1x1x128xf32> to vector<1x128xf32>
    %63 = vector.shape_cast %60 : vector<1x128xf32> to vector<1x1x1x128xf32>
    tpu.vector_store %arg4[%c0_56, %c2_57, %c0_58, %c0_59], %63 {strides = array<i32>} : memref<1x5x1x128xf32, #tpu.memory_space<vmem>>, vector<1x1x1x128xf32>,
    %c0_60 = arith.constant 0 : index
    %c3_61 = arith.constant 3 : index
    %c0_62 = arith.constant 0 : index
    %c0_63 = arith.constant 0 : index
    %64 = vector.load %arg4[%c0_60, %c3_61, %c0_62, %c0_63] : memref<1x5x1x128xf32, #tpu.memory_space<vmem>>, vector<1x1x1x128xf32>
    %65 = vector.shape_cast %64 : vector<1x1x1x128xf32> to vector<1x128xf32>
    %66 = arith.mulf %38, %4 : vector<2x128xf32>
    %cst_64 = arith.constant dense<0.000000e+00> : vector<128xf32>
    %67 = vector.multi_reduction <add>, %66, %cst_64 [0] : vector<2x128xf32> to vector<128xf32>
    %68 = vector.shape_cast %67 : vector<128xf32> to vector<1x128xf32>
    %69 = arith.addf %65, %68 : vector<1x128xf32>
    %c0_65 = arith.constant 0 : index
    %c3_66 = arith.constant 3 : index
    %c0_67 = arith.constant 0 : index
    %c0_68 = arith.constant 0 : index
    %70 = vector.load %arg4[%c0_65, %c3_66, %c0_67, %c0_68] : memref<1x5x1x128xf32, #tpu.memory_space<vmem>>, vector<1x1x1x128xf32>
    %71 = vector.shape_cast %70 : vector<1x1x1x128xf32> to vector<1x128xf32>
    %72 = vector.shape_cast %69 : vector<1x128xf32> to vector<1x1x1x128xf32>
    tpu.vector_store %arg4[%c0_65, %c3_66, %c0_67, %c0_68], %72 {strides = array<i32>} : memref<1x5x1x128xf32, #tpu.memory_space<vmem>>, vector<1x1x1x128xf32>,
    %c0_69 = arith.constant 0 : index
    %c4 = arith.constant 4 : index
    %c0_70 = arith.constant 0 : index
    %c0_71 = arith.constant 0 : index
    %73 = vector.load %arg4[%c0_69, %c4, %c0_70, %c0_71] : memref<1x5x1x128xf32, #tpu.memory_space<vmem>>, vector<1x1x1x128xf32>
    %74 = vector.shape_cast %73 : vector<1x1x1x128xf32> to vector<1x128xf32>
    %cst_72 = arith.constant dense<0.000000e+00> : vector<128xf32>
    %75 = vector.multi_reduction <add>, %4, %cst_72 [0] : vector<2x128xf32> to vector<128xf32>
    %76 = vector.shape_cast %75 : vector<128xf32> to vector<1x128xf32>
    %77 = arith.addf %74, %76 : vector<1x128xf32>
    %c0_73 = arith.constant 0 : index
    %c4_74 = arith.constant 4 : index
    %c0_75 = arith.constant 0 : index
    %c0_76 = arith.constant 0 : index
    %78 = vector.load %arg4[%c0_73, %c4_74, %c0_75, %c0_76] : memref<1x5x1x128xf32, #tpu.memory_space<vmem>>, vector<1x1x1x128xf32>
    %79 = vector.shape_cast %78 : vector<1x1x1x128xf32> to vector<1x128xf32>
    %80 = vector.shape_cast %77 : vector<1x128xf32> to vector<1x1x1x128xf32>
    tpu.vector_store %arg4[%c0_73, %c4_74, %c0_75, %c0_76], %80 {strides = array<i32>} : memref<1x5x1x128xf32, #tpu.memory_space<vmem>>, vector<1x1x1x128xf32>,
    return
  }
  func.func @transform_0(%arg0: i32, %arg1: i32) -> (i32, i32, i32, i32) {
    %c0_i32 = arith.constant 0 : i32
    %c0_i32_0 = arith.constant 0 : i32
    %c0_i32_1 = arith.constant 0 : i32
    return %arg0, %c0_i32, %arg1, %c0_i32_0 : i32, i32, i32, i32
  }
  func.func @transform_1(%arg0: i32, %arg1: i32) -> (i32, i32, i32, i32) {
    %c0_i32 = arith.constant 0 : i32
    %c0_i32_0 = arith.constant 0 : i32
    %c0_i32_1 = arith.constant 0 : i32
    return %arg0, %c0_i32, %arg1, %c0_i32_0 : i32, i32, i32, i32
  }
  func.func @transform_2(%arg0: i32, %arg1: i32) -> (i32, i32, i32, i32) {
    %c0_i32 = arith.constant 0 : i32
    %c0_i32_0 = arith.constant 0 : i32
    %c0_i32_1 = arith.constant 0 : i32
    %c0_i32_2 = arith.constant 0 : i32
    return %arg0, %c0_i32, %c0_i32_0, %c0_i32_1 : i32, i32, i32, i32
  }
}

</mosaic_0001>

<bundles_post_ra>
// kernel: tpu_custom_call.1
= control target key start
LH: loop header
LB: loop body
LE: loop exit
PB: predicated region body
PF: predicated region fallthrough
CT: control target
= control target key end

     0   :  { %7 = vsyncpa [#allocation3], 0  ;;  %s957_s0 = inlined_call_operand.hbm [shape: f32[2,4,2,128], index: 0, kind: input, shape index: {}]   ;;  %s958_s1 = inlined_call_operand.hbm [shape: f32[2,1,2,128], index: 1, kind: input, shape index: {}]   ;;  %s959_s2 = inlined_call_operand.hbm [shape: f32[2,5,1,128], index: 2, kind: output, shape index: {}]  }
   0x1   :  { %9 = vsyncpa [#allocation3 + $0x1], 0 }
   0x2   :  { %10 = vsyncpa [#allocation6], 0 }
   0x3   :  { %12 = vsyncpa [#allocation6 + $0x1], 0 }
   0x4   :  { %13 = vsyncpa [#allocation4], 0 }
   0x5   :  { %15 = vsyncpa [#allocation4 + $0x1], 0  ;;  %s716_s9 = smov 0   ;;  %s718_s10 = smov 0  }
   0x6   :  { %s720_s11 = smov 0   ;;  %s722_s12 = smov 0  }
   0x7   :  { %s724_s13 = smov 0   ;;  %s726_s14 = smov 0  }
   0x8 LB: > { %s434_s15 = sadd.s32 4294967295, %s691_s14   ;;  %s435_s16 = sadd.s32 4294967294, %s691_s14   ;;  %s691_s14 = sphi %s726_s14, %s21_s14   ;;  %s687_s13 = sphi %s724_s13, %s978_s13   ;;  %s683_s12 = sphi %s722_s12, %s977_s12   ;;  %s679_s11 = sphi %s720_s11, %s976_s11   ;;  %s675_s10 = sphi %s718_s10, %s975_s10   ;;  %s671_s9 = sphi %s716_s9, %s974_s9  }
   0x9   : > { %s33_s17 = sadd.s32 1, %s687_s13  ;;  %s42_s18 = sadd.s32 1, %s679_s11 }
   0xa   : > { %p35_p0 = scmp.ge.s32.totalorder %s33_s17, 2  ;;  %p49_p1 = scmp.ne.s32.totalorder %s679_s11, %s675_s10 }
   0xb   : > { %p50_p2 = scmp.eq.s32.totalorder %s691_s14, 0  ;;  %p55_p3 = scmp.ne.s32.totalorder %s675_s10, %s671_s9 }
   0xc   : > { %s980_s17 = smov (%p35_p0, %s33_s17), 0  ;;  %p56_p5 = scmp.eq.s32.totalorder %s434_s15, 0 }
   0xd   : > { %p757_p4 = por %p50_p2, %p49_p1  ;;  %s37_s20 = ssub.s32 %s687_s13, %s980_s17 }
   0xe   : > { %p107_p6 = scmp.eq.s32.totalorder %s434_s15, 1  ;;  %p40_p7 = scmp.eq.s32.totalorder %s37_s20, 0 }
   0xf   : > { %p763_p8 = por %p56_p5, %p55_p3  ;;  %p113_p10 = scmp.eq.s32.totalorder %s435_s16, 1 }
  0x10   : > { %p767_p9 = por %p107_p6, %p49_p1  ;;  %p480_p13 = scmp.lt.s32.totalorder %s691_s14, 2 }
  0x11   : > { %s963_s21 = scalar_select %p763_p8, 1, 0 }
  0x12   : > { %s964_s22 = scalar_select %p767_p9, 1, 0 }
  0x13   : > { %s772_s23 = scalar_select %p40_p7, %s679_s11, %s42_s18  }
  0x14   : > { %p774_p11 = por %p113_p10, %p55_p3  ;;  %s781_s25 = sand.u32 1, %s679_s11  }
  0x15   : > { %s438_s26 = sshll.u32 %s781_s25, 3  ;;  %s460_s27 = sshll.u32 %s687_s13, 7 }
  0x16   : > { %s965_s24 = scalar_select %p774_p11, 1, 0 }
  0x17   : > { %s788_s30 = scalar_lea.hbm %s957_s0, %s460_s27  ;;  %s137_s3 = scalar_lea.vmem [#allocation2], %s438_s26 }
  0x18   : > { %s145_s4 = sshll.u32 %s137_s3, 4  ;;  %p794_p0 = pnand %p480_p13, %p757_p4  ;;  %s790_s4 = int_to_ptr.vmem [resolvable:$true] %s145_s4 }
  0x19   : > { %s134_s6 = scalar_lea.sflag [#allocation3], %s781_s25  ;;  %s545_s7 = scalar_lea.hbm %s788_s30, 128 }
  0x1a   : > { %p546_p2 = scmp.ne.s32.totalorder %s788_s30, %s545_s7  ;;  %p547_p3 = pneg %p794_p0 }
  0x1b   : > { %s550_s16 = scalar_lea.hbm %s957_s0, 256  ;;  %p551_p4 = scmp.lt.u32.totalorder %s788_s30, %s957_s0 }
  0x1c   : > { %p548_p5 = pnand %p547_p3, %p546_p2  ;;  %p552_p7 = scmp.lt.u32.totalorder %s550_s16, %s545_s7 }
  0x1d   : > { %p554_p13 = scmp.lt.u32.totalorder %s545_s7, %s788_s30 }
  0x1e   : > { %p549_p6 = pneg %p548_p5  ;;  %p553_p10 = por %p552_p7, %p551_p4 }
  0x20   : > { %p555_p12 = por %p554_p13, %p553_p10 }
  0x22   : > { %p556_p1 = pnand %p555_p12, %p549_p6 }
  0x24   : > { %559 = shalt.err (!%p556_p1)
}
  0x25   : > { %s560_s20 = scalar_lea.vmem %s790_s4, 128  ;;  %s693_s26 = smov [#allocation2]  }
  0x26   : > { %p561_p2 = scmp.ne.s32.totalorder %s790_s4, %s560_s20  ;;  %s565_s27 = sshll.u32 %s693_s26, 4  ;;  %s566_s27 = int_to_ptr.vmem [resolvable:$false] %s565_s27 }
  0x27   : > { %s567_s28 = scalar_lea.vmem %s566_s27, 256  ;;  %p568_p9 = scmp.lt.s32.totalorder %s790_s4, %s566_s27 }
  0x28   : > { %p563_p5 = pnand %p561_p2, %p547_p3  ;;  %p569_p4 = scmp.lt.s32.totalorder %s567_s28, %s560_s20 }
  0x2a   : > { %p564_p11 = pneg %p563_p5  ;;  %p570_p7 = por %p569_p4, %p568_p9 }
  0x2c   : > { %p571_p10 = pnand %p570_p7, %p564_p11 }
  0x2e   : > { %574 = shalt.err (!%p571_p10)
}
  0x2f   : > { %s694_s29 = smov 32   ;;  %s695_s3 = smov 2  }
  0x30   : > { %472 = dma.hbm_to_vmem [thread:$0]  (!%p794_p0), %s788_s30, 128, %s790_s4, %s134_s6, %s694_s29, %s694_s29, %s695_s3  }
  0x31   : > { %p172_p12 = scmp.lt.s32.totalorder %s691_s14, 3  ;;  %s441_s7 = sshll.u32 %s781_s25, 1 }
  0x32   : > { %s442_s8 = sshll.u32 %s687_s13, 5  ;;  %p967_p9 = scmp.ge.s32.totalorder %s691_s14, 1 }
  0x33   : > { %s839_s19 = scalar_lea.hbm %s958_s1, %s442_s8  ;;  %s159_s20 = scalar_lea.vmem [#allocation5], %s441_s7 }
  0x34   : > { %p832_p11 = pnand %p967_p9, %p172_p12  ;;  %s167_s26 = sshll.u32 %s159_s20, 4  ;;  %s168_s26 = int_to_ptr.vmem [resolvable:$true] %s167_s26 }
  0x35   : > { %s156_s30 = scalar_lea.sflag [#allocation6], %s781_s25  ;;  %s575_s4 = scalar_lea.hbm %s839_s19, 32 }
  0x36   : > { %s968_s15 = scalar_select %p832_p11, 1, 0 }
  0x37   : > { %p576_p1 = scmp.ne.s32.totalorder %s839_s19, %s575_s4  ;;  %s580_s28 = scalar_lea.hbm %s958_s1, 64 }
  0x38   : > { %p581_p2 = scmp.lt.u32.totalorder %s839_s19, %s958_s1  ;;  %p582_p5 = scmp.lt.u32.totalorder %s580_s28, %s575_s4 }
  0x39   : > { %p578_p6 = pnand %p576_p1, %p547_p3  ;;  %p584_p7 = scmp.lt.u32.totalorder %s575_s4, %s839_s19 }
  0x3a   : > { %p583_p4 = por %p582_p5, %p581_p2 }
  0x3b   : > { %p579_p13 = pneg %p578_p6 }
  0x3c   : > { %p585_p10 = por %p584_p7, %p583_p4 }
  0x3e   : > { %p586_p12 = pnand %p585_p10, %p579_p13 }
  0x40   : > { %589 = shalt.err (!%p586_p12)
}
  0x41   : > { %s590_s25 = scalar_lea.vmem %s168_s26, 32  ;;  %s696_s7 = smov [#allocation5]  }
  0x42   : > { %p591_p9 = scmp.ne.s32.totalorder %s168_s26, %s590_s25  ;;  %s595_s8 = sshll.u32 %s696_s7, 4  ;;  %s596_s8 = int_to_ptr.vmem [resolvable:$false] %s595_s8 }
  0x43   : > { %s597_s16 = scalar_lea.vmem %s596_s8, 64  ;;  %p598_p8 = scmp.lt.s32.totalorder %s168_s26, %s596_s8 }
  0x44   : > { %p593_p1 = pnand %p591_p9, %p547_p3  ;;  %p599_p11 = scmp.lt.s32.totalorder %s597_s16, %s590_s25 }
  0x46   : > { %p594_p6 = pneg %p593_p1  ;;  %p600_p2 = por %p599_p11, %p598_p8 }
  0x48   : > { %p601_p5 = pnand %p600_p2, %p594_p6 }
  0x4a   : > { %604 = shalt.err (!%p601_p5)
}
  0x4b   : > { %475 = dma.hbm_to_vmem [thread:$0]  (!%p794_p0), %s839_s19, 32, %s168_s26, %s156_s30  }
  0x4c   : > { %p969_p13 = scmp.ne.s32.totalorder %s968_s15, 0 }
  0x4d   : > { %s864_s18 = sand.u32 (!%p969_p13), 1, %s675_s10   ;;  %p970_p3 = scmp.ne.s32.totalorder (!%p969_p13), %s963_s21, 0 }
  0x4e   : > { %176 = sbr.rel (%p969_p13) target bundleno = 164 (0xa4), region = 28  ;;  %s444_s20 = sshll.u32 (!%p969_p13), %s864_s18, 3 }
  0x4f   : > { %s179_s4 = scalar_lea.sflag (!%p969_p13), [#allocation3], %s864_s18  ;;  %s182_s6 = scalar_lea.vmem (!%p969_p13), [#allocation2], %s444_s20 }
  0x55   : > { %658 = dma.done.wait (%p970_p3), %s179_s4, 128  }
  0x56   : > { %660 = vsyncadd (%p970_p3), %s179_s4, 4294967168  ;;  %s445_s5 = sshll.u32 %s864_s18, 1  ;;  %s188_s15 = scalar_lea.sflag [#allocation6], %s864_s18 }
  0x57   : > { %s191_s19 = scalar_lea.vmem [#allocation5], %s445_s5 }
  0x58   : > { %662 = dma.done.wait (%p970_p3), %s188_s15, 32  }
  0x59   : > { %664 = vsyncadd (%p970_p3), %s188_s15, 4294967264  ;;  %s461_s26 = smul.u32 5, %s864_s18  ;;  %v697_v0 = vmov 0.0   ;;  %vm257_vm0 = vcmask 1041408   ;;  %v227_v1 = vld [vmem:[%s182_s6] sm:$0x3] }
  0x5a   : > { %v446_v2 = vld [vmem:[%s182_s6 + $0x2] sm:$0x3]  ;;  %v447_v3 = vld [vmem:[%s182_s6 + $0x4] sm:$0x3]  ;;  %v226_v5 = vld [vmem:[%s191_s19] sm:$0x3] }
  0x5b   : > { %s879_s30 = scalar_lea.vmem [#allocation7], %s461_s26  ;;  %v230_v4 = vmax.f32 %v227_v1, %v446_v2  ;;  %v448_v6 = vld [vmem:[%s182_s6 + $0x6] sm:$0x3]  ;;  %v304_v7 = vsel %vm257_vm0, %v226_v5, 0.0  ;;  %s462_s21 = smul.u32 80, %s683_s12 }
  0x5c   : > { %221 = vst [vmem:[%s879_s30] sm:$0x1] %v697_v0  ;;  %222 = vst [vmem:[%s879_s30 + $0x1] sm:$0x1] %v697_v0  ;;  %v305_v9 = vrot.slane %v304_v7, 4  ;;  %s327_s27 = sshll.u32 %s879_s30, 4  ;;  %s314_s12 = scalar_lea.sflag [#allocation4], %s864_s18  ;;  %s906_s27 = int_to_ptr.vmem [resolvable:$true] %s327_s27 }
  0x5d   : > { %223 = vst [vmem:[%s879_s30 + $0x2] sm:$0x1] %v697_v0  ;;  %224 = vst [vmem:[%s879_s30 + $0x3] sm:$0x1] %v697_v0  ;;  %v233_v8 = vmax.f32 %v230_v4, %v447_v3  ;;  %s904_s3 = scalar_lea.hbm %s959_s2, %s462_s21  ;;  %s605_s25 = scalar_lea.vmem %s906_s27, 80 }
  0x5e   : > { %225 = vst [vmem:[%s879_s30 + $0x4] sm:$0x1] %v697_v0  ;;  %v306_v11 = vadd.f32 %v305_v9, %v304_v7  ;;  %p606_p8 = scmp.ne.s32.totalorder %s906_s27, %s605_s25  ;;  %p971_p0 = scmp.ne.s32.totalorder %s964_s22, 0 }
  0x5f   : > { %v236_v10 = vmax.f32 %v233_v8, %v448_v6  ;;  %s698_s7 = smov [#allocation7]  }
  0x60   : > { %v307_v16 = vrot.slane %v306_v11, 2  ;;  %p607_p11 = pnand %p606_p8, %p971_p0  ;;  %s609_s8 = sshll.u32 %s698_s7, 4  ;;  %s610_s8 = int_to_ptr.vmem [resolvable:$false] %s609_s8 }
  0x61   : > { %v237_v12 = vsub.f32 %v227_v1, %v236_v10  ;;  %v240_v13 = vsub.f32 %v446_v2, %v236_v10  ;;  %v244_v14 = vsub.f32 %v447_v3, %v236_v10  ;;  %v248_v15 = vsub.f32 %v448_v6, %v236_v10  ;;  %s611_s16 = scalar_lea.vmem %s610_s8, 160  ;;  %p612_p7 = scmp.lt.s32.totalorder %s906_s27, %s610_s8 }
  0x62   : > { %v308_v21 = vadd.f32 %v307_v16, %v306_v11  ;;  %p608_p4 = pneg %p607_p11  ;;  %p613_p10 = scmp.lt.s32.totalorder %s611_s16, %s605_s25 }
  0x63   : > { %v238_v17 = vmul.f32 1.442695, %v237_v12  ;;  %v241_v18 = vmul.f32 1.442695, %v240_v13  ;;  %v245_v19 = vmul.f32 1.442695, %v244_v14 }
  0x64   : > { %v249_v20 = vmul.f32 1.442695, %v248_v15  ;;  %v309_v22 = vrot.slane %v308_v21, 1  ;;  %v256_v60 = vld [vmem:[%s879_s30] sm:$0x1]  ;;  %p614_p12 = por %p613_p10, %p612_p7 }
  0x65   : > { %535 = vpow2.f32 %v238_v17  ;;  %v455_v23 = vld [vmem:[%s879_s30 + $0x4] sm:$0x1]  ;;  %v449_v61 = vld [vmem:[%s879_s30 + $0x1] sm:$0x1]  ;;  %v451_v2 = vld [vmem:[%s879_s30 + $0x2] sm:$0x1] }
  0x66   : > { %537 = vpow2.f32 %v241_v18  ;;  %v310_v24 = vadd.f32 %v309_v22, %v308_v21  ;;  %v453_v3 = vld [vmem:[%s879_s30 + $0x3] sm:$0x1]  ;;  %p615_p9 = pnand %p614_p12, %p608_p4 }
  0x67   : > { %539 = vpow2.f32 %v245_v19 }
  0x68   : > { %541 = vpow2.f32 %v249_v20  ;;  %v311_v25 = vadd.f32 %v455_v23, %v310_v24 }
  0x6a   : > { %456 = vst [vmem:[%s879_s30 + $0x4] sm:$0x1] %v311_v25 }
  0x6f   : > { %v536_v26 = vpop.eup %535 }
  0x70   : > { %v538_v27 = vpop.eup %537 }
  0x71   : > { %v540_v28 = vpop.eup %539  ;;  %v243_v29 = vadd.f32 %v538_v27, %v536_v26 }
  0x72   : > { %v542_v30 = vpop.eup %541 }
  0x73   : > { %v247_v31 = vadd.f32 %v540_v28, %v243_v29 }
  0x75   : > { %v251_v32 = vadd.f32 %v542_v30, %v247_v31 }
  0x77   : > { %543 = vrcp.f32 %v251_v32 }
  0x81   : > { %v544_v33 = vpop.eup %543 }
  0x82   : > { %v254_v34 = vmul.f32 %v544_v33, %v536_v26  ;;  %v255_v35 = vmul.f32 %v544_v33, %v538_v27 }
  0x84   : > { %v258_v36 = vsel %vm257_vm0, %v254_v34, 0.0  ;;  %v269_v37 = vsel %vm257_vm0, %v255_v35, 0.0  ;;  %v280_v38 = vmul.f32 %v254_v34, %v226_v5  ;;  %v292_v39 = vmul.f32 %v255_v35, %v226_v5 }
  0x85   : > { %v259_v40 = vrot.slane %v258_v36, 4  ;;  %v270_v41 = vrot.slane %v269_v37, 4 }
  0x86   : > { %v281_v42 = vsel %vm257_vm0, %v280_v38, 0.0  ;;  %v293_v43 = vsel %vm257_vm0, %v292_v39, 0.0 }
  0x87   : > { %v260_v44 = vadd.f32 %v259_v40, %v258_v36  ;;  %v271_v45 = vadd.f32 %v270_v41, %v269_v37  ;;  %v282_v46 = vrot.slane %v281_v42, 4  ;;  %v294_v47 = vrot.slane %v293_v43, 4 }
  0x89   : > { %v261_v48 = vrot.slane %v260_v44, 2  ;;  %v272_v49 = vrot.slane %v271_v45, 2  ;;  %v283_v50 = vadd.f32 %v282_v46, %v281_v42  ;;  %v295_v51 = vadd.f32 %v294_v47, %v293_v43 }
  0x8b   : > { %v262_v52 = vadd.f32 %v261_v48, %v260_v44  ;;  %v273_v53 = vadd.f32 %v272_v49, %v271_v45  ;;  %v284_v54 = vrot.slane %v283_v50, 2  ;;  %v296_v55 = vrot.slane %v295_v51, 2 }
  0x8d   : > { %v263_v56 = vrot.slane %v262_v52, 1  ;;  %v274_v57 = vrot.slane %v273_v53, 1  ;;  %v285_v58 = vadd.f32 %v284_v54, %v283_v50  ;;  %v297_v59 = vadd.f32 %v296_v55, %v295_v51 }
  0x8f   : > { %v264_v62 = vadd.f32 %v263_v56, %v262_v52  ;;  %v275_v63 = vadd.f32 %v274_v57, %v273_v53  ;;  %v286_v0 = vrot.slane %v285_v58, 1  ;;  %v298_v1 = vrot.slane %v297_v59, 1 }
  0x91   : > { %v265_v4 = vadd.f32 %v264_v62, %v256_v60  ;;  %v276_v5 = vadd.f32 %v449_v61, %v275_v63  ;;  %v287_v6 = vadd.f32 %v286_v0, %v285_v58  ;;  %v299_v7 = vadd.f32 %v298_v1, %v297_v59 }
  0x93   : > { %266 = vst [vmem:[%s879_s30] sm:$0x1] %v265_v4  ;;  %450 = vst [vmem:[%s879_s30 + $0x1] sm:$0x1] %v276_v5  ;;  %v288_v8 = vadd.f32 %v451_v2, %v287_v6  ;;  %v300_v9 = vadd.f32 %v453_v3, %v299_v7 }
  0x95   : > { %452 = vst [vmem:[%s879_s30 + $0x2] sm:$0x1] %v288_v8  ;;  %454 = vst [vmem:[%s879_s30 + $0x3] sm:$0x1] %v300_v9 }
  0x96   : > { %618 = shalt.err (!%p615_p9)
}
  0x97   : > { %s619_s20 = scalar_lea.hbm %s904_s3, 80  ;;  %s623_s5 = scalar_lea.hbm %s959_s2, 160 }
  0x98   : > { %p620_p1 = scmp.ne.s32.totalorder %s904_s3, %s619_s20  ;;  %p624_p5 = scmp.lt.u32.totalorder %s904_s3, %s959_s2 }
  0x99   : > { %p625_p13 = scmp.lt.u32.totalorder %s623_s5, %s619_s20  ;;  %p627_p8 = scmp.lt.u32.totalorder %s619_s20, %s904_s3 }
  0x9a   : > { %p621_p6 = pnand %p620_p1, %p971_p0 }
  0x9b   : > { %p626_p3 = por %p625_p13, %p624_p5 }
  0x9c   : > { %p622_p2 = pneg %p621_p6 }
  0x9d   : > { %p628_p11 = por %p627_p8, %p626_p3 }
  0x9f   : > { %p629_p4 = pnand %p628_p11, %p622_p2 }
  0xa1   : > { %632 = shalt.err (!%p629_p4)
}
  0xa2   : > { %s699_s26 = smov 16   ;;  %s700_s30 = smov 1  }
  0xa3   : > { %467 = dma.vmem_to_hbm [thread:$0]  (%p971_p0), %s906_s27, 80, %s904_s3, %s314_s12, %s699_s26, %s699_s26, %s700_s30  }
  0xa4 PF: > { %s342_s21 = sand.u32 1, %s671_s9   ;;  %p972_p7 = scmp.ne.s32.totalorder %s965_s24, 0 }
  0xa5   : > { %p973_p10 = scmp.ge.s32.totalorder %s691_s14, 2  ;;  %s343_s28 = scalar_lea.sflag [#allocation4], %s342_s21 }
  0xa7   : > { %p477_p12 = pnand %p973_p10, %p972_p7 }
  0xa9   : > { %666 = dma.done.wait (!%p477_p12), %s343_s28, 80  }
  0xaa   : > { %668 = vsyncadd (!%p477_p12), %s343_s28, 4294967216  ;;  %s21_s14 = sadd.s32 1, %s691_s14   ;;  %s974_s9 = smov %s675_s10 }
  0xab   : > { %p18_p9 = scmp.ge.s32.totalorder %s21_s14, 4   ;;  %s975_s10 = smov %s679_s11 }
  0xac   : > { %s976_s11 = smov %s772_s23  ;;  %s977_s12 = smov %s687_s13 }
  0xad   : > { %s978_s13 = smov %s980_s17  ;;  %20 = sbr.rel (!%p18_p9) target bundleno = 8 (0x8), region = 97 }
  0xb4   :  { %348 = vsyncpa [#allocation3], 1 }
  0xb5   :  { %350 = vsyncpa [#allocation3 + $0x1], 1 }
  0xb6   :  { %351 = vsyncpa [#allocation6], 1 }
  0xb7   :  { %353 = vsyncpa [#allocation6 + $0x1], 1 }
  0xb8   :  { %354 = vsyncpa [#allocation4], 1 }
  0xb9   :  { %356 = vsyncpa [#allocation4 + $0x1], 1 }

</bundles_post_ra>
